<compile_context>
chip_gen: v6e
topology: v6e:2x2x1
jax: 0.10.0
libtpu: 0.0.40
codegen_flags: <defaults>
</compile_context>

<pallas_src>
import math

import jax
import jax.numpy as jnp
from jax import lax
from jax.experimental import pallas as pl
from jax.experimental.pallas import tpu as pltpu


def attention_pool_kernel(x_ref, w_kv_ref, wq_ref, wc_ref,
                          pos0q_ref, pos0kv_ref, pos_kv_ref,
                          seg_ref, segt_ref, bc_ref, out_ref):
    TB, HW, C = x_ref.shape
    H = seg_ref.shape[1]
    f32 = jnp.float32

    x = x_ref[...]                                            # (TB, HW, C) bf16

    # --- fused k|v projection of all TB*HW spatial tokens: one big MXU matmul.
    kv_x = lax.dot_general(x.reshape(TB * HW, C), w_kv_ref[...],
                           (((1,), (1,)), ((), ())),
                           preferred_element_type=f32)        # (TB*HW, 2C)
    kv_x = kv_x.reshape(TB, HW, 2 * C)
    # cls-token k/v reuse the same matmul via linearity of the projection.
    kv_mean = jnp.mean(kv_x, axis=1)                          # (TB, 2C) f32
    kv = kv_x + pos_kv_ref[...][None]                         # + (pos_hw @ Wkv^T + b_kv)
    k_hw = kv[:, :, :C]                                       # (TB, HW, C)
    v_hw = kv[:, :, C:]                                       # (TB, HW, C)

    k0v0 = kv_mean + pos0kv_ref[...]                          # (TB, 2C)
    k0 = k0v0[:, :C]
    v0 = k0v0[:, C:]

    # --- cls-token query (Wq already pre-scaled by 1/sqrt(head_dim)).
    mean_tok = jnp.mean(x.astype(f32), axis=1)                # (TB, C) f32
    q0 = lax.dot_general(mean_tok.astype(x.dtype), wq_ref[...],
                         (((1,), (1,)), ((), ())),
                         preferred_element_type=f32) + pos0q_ref[...]   # (TB, C)

    # --- per-head scores via block one-hot segment matmul (no head loop).
    seg = seg_ref[...]                                        # (C, H) f32
    segt = segt_ref[...]                                      # (H, C) f32
    qk = (k_hw * q0[:, None, :]).reshape(TB * HW, C)          # f32 VPU
    s_hw = jnp.dot(qk, seg, preferred_element_type=f32).reshape(TB, HW, H)
    s0 = jnp.dot(q0 * k0, seg, preferred_element_type=f32)    # (TB, H)

    # Softmax over the (HW + 1) tokens (cls score merged with the spatial max).
    m = jnp.maximum(jnp.max(s_hw, axis=1), s0)                # (TB, H)
    p_hw = jnp.exp(s_hw - m[:, None, :])                      # (TB, HW, H)
    p0 = jnp.exp(s0 - m)                                      # (TB, H)
    inv = pl.reciprocal(p0 + jnp.sum(p_hw, axis=1), approx=True)   # (TB, H)

    # --- weighted values: expand head probabilities back to C lanes, reduce.
    p_full = jnp.dot(p_hw.reshape(TB * HW, H), segt,
                     preferred_element_type=f32).reshape(TB, HW, C)
    o = (jnp.dot(p0, segt, preferred_element_type=f32) * v0
         + jnp.sum(p_full * v_hw, axis=1))                    # (TB, C) f32
    o = o * jnp.dot(inv, segt, preferred_element_type=f32)

    # --- output projection.
    out = lax.dot_general(o.astype(x.dtype), wc_ref[...],
                          (((1,), (1,)), ((), ())),
                          preferred_element_type=f32) + bc_ref[...]
    out_ref[...] = out.astype(out_ref.dtype)


def attention_pool2d(x_nchw, params, num_heads, *, target_rows=256):
    N, C, Hs, Ws = x_nchw.shape
    HW = Hs * Ws
    O = params["wc"].shape[0]
    D = C // num_heads
    scale = 1.0 / math.sqrt(D)
    f32 = jnp.float32

    # ---- parameter folding (plain JAX; cheap and jit-cached) ----------------
    wq_s = params["wq"].astype(f32) * scale                    # fold 1/sqrt(D) into Wq
    bq_s = params["bq"].astype(f32) * scale
    w_kv = jnp.concatenate([params["wk"], params["wv"]], axis=0).astype(f32)  # (2C, C)
    b_kv = jnp.concatenate([params["bk"], params["bv"]]).astype(f32)          # (2C,)
    pos = params["pos"].astype(f32)                            # (HW + 1, C)
    pos0_q = pos[0:1] @ wq_s.T + bq_s[None, :]                 # (1, C)
    pos0_kv = pos[0:1] @ w_kv.T + b_kv[None, :]                # (1, 2C)
    pos_kv = pos[1:] @ w_kv.T + b_kv[None, :]                  # (HW, 2C)
    seg = (jnp.arange(C)[:, None] // D ==
           jnp.arange(num_heads)[None, :]).astype(f32)         # (C, H) head one-hot
    segt = seg.T                                               # (H, C)
    bc = params["bc"].reshape(1, O).astype(f32)

    # bf16 operands for the MXU-heavy matmuls (f32 accumulation in-kernel).
    w_kv_b = w_kv.astype(jnp.bfloat16)
    wq_b = wq_s.astype(jnp.bfloat16)
    wc_b = params["wc"].astype(jnp.bfloat16)

    # ---- batch folding: TB batch elements per grid step ---------------------
    TB = max(1, min(N, -(-target_rows // HW)))
    grid_n = -(-N // TB)
    if grid_n > 1 and TB % 8 != 0:                             # (8,·) alignment of out block
        TB = -(-TB // 8) * 8
        grid_n = -(-N // TB)
    N_pad = grid_n * TB

    # NCHW -> token-major (N, HW, C); pad batch to a multiple of TB.
    # (The transpose is a one-time XLA layout pass over x; padded rows are zero
    #  and sliced off after the kernel, so they never affect real outputs.)
    x_tok = jnp.transpose(x_nchw.reshape(N, C, HW), (0, 2, 1)).astype(jnp.bfloat16)
    if N_pad != N:
        x_tok = jnp.concatenate(
            [x_tok, jnp.zeros((N_pad - N, HW, C), jnp.bfloat16)], axis=0)

    consts = (w_kv_b, wq_b, wc_b, pos0_q, pos0_kv, pos_kv, seg, segt, bc)

    def const_spec(a):
        nd = a.ndim
        return pl.BlockSpec(a.shape, lambda g: (0,) * nd)

    # Raise the scoped-VMEM limit only when weights / tiles are actually large
    # (CLIP-size embed dims); the constant weights are double-buffered by the
    # default pipeline, so budget them twice.
    cp = dict(dimension_semantics=("parallel",))
    est_bytes = (sum(int(a.size) * a.dtype.itemsize for a in consts) * 2
                 + 2 * TB * HW * C * 2 + 2 * TB * O * 4 + (4 << 20))
    if est_bytes > (16 << 20):
        cp["vmem_limit_bytes"] = min(2 * est_bytes, 100 * 1024 * 1024)

    out = pl.pallas_call(
        attention_pool_kernel,
        out_shape=jax.ShapeDtypeStruct((N_pad, O), x_nchw.dtype),
        grid=(grid_n,),
        in_specs=[pl.BlockSpec((TB, HW, C), lambda g: (g, 0, 0))]
                 + [const_spec(a) for a in consts],
        out_specs=pl.BlockSpec((TB, O), lambda g: (g, 0)),
        compiler_params=pltpu.CompilerParams(**cp),
    )(x_tok, *consts)
    return out[:N]


def reference(x_nchw, p, num_heads):
    """Pure-JAX replica of the torch forward (full MHA, then take token 0)."""
    N, C, H, W = x_nchw.shape
    HW = H * W
    S = HW + 1
    D = C // num_heads
    x = jnp.transpose(x_nchw.reshape(N, C, HW), (2, 0, 1))           # (HW, N, C)
    x = jnp.concatenate([x.mean(axis=0, keepdims=True), x], axis=0)  # (S, N, C)
    x = x + p["pos"][:, None, :]
    q = x @ p["wq"].T + p["bq"]
    k = x @ p["wk"].T + p["bk"]
    v = x @ p["wv"].T + p["bv"]

    def split(t):
        return jnp.transpose(t.reshape(S, N, num_heads, D), (1, 2, 0, 3))

    qh, kh, vh = split(q), split(k), split(v)
    sc = jnp.einsum("nhqd,nhkd->nhqk", qh * (D ** -0.5), kh)
    a = jax.nn.softmax(sc, axis=-1)
    o = jnp.einsum("nhqk,nhkd->nhqd", a, vh)
    o = jnp.transpose(o, (2, 0, 1, 3)).reshape(S, N, C)
    out = o @ p["wc"].T + p["bc"]
    return out[0]                                                    # (N, O)


if __name__ == "__main__":
    N, C, Hs, Ws = 2, 32, 4, 4        # batch, embed_dim, spatial
    num_heads = 4
    output_dim = 64
    S = Hs * Ws + 1

    key = jax.random.PRNGKey(0)
    ks = jax.random.split(key, 10)
    params = {
        "pos": jax.random.normal(ks[0], (S, C), jnp.float32) / math.sqrt(C),
        "wq": jax.random.normal(ks[1], (C, C), jnp.float32) / math.sqrt(C),
        "bq": jax.random.normal(ks[2], (C,), jnp.float32) * 0.02,
        "wk": jax.random.normal(ks[3], (C, C), jnp.float32) / math.sqrt(C),
        "bk": jax.random.normal(ks[4], (C,), jnp.float32) * 0.02,
        "wv": jax.random.normal(ks[5], (C, C), jnp.float32) / math.sqrt(C),
        "bv": jax.random.normal(ks[6], (C,), jnp.float32) * 0.02,
        "wc": jax.random.normal(ks[7], (output_dim, C), jnp.float32) / math.sqrt(C),
        "bc": jax.random.normal(ks[8], (output_dim,), jnp.float32) * 0.02,
    }
    x = jax.random.normal(ks[9], (N, C, Hs, Ws), jnp.float32)

    # Quantize inputs to bf16-representable values so the bf16-MXU kernel and the
    # fp32 reference see identical operands (isolates kernel arithmetic error).
    q16 = lambda a: a.astype(jnp.bfloat16).astype(jnp.float32)
    params = jax.tree_util.tree_map(q16, params)
    x = q16(x)

    out = attention_pool2d(x, params, num_heads)
    out = jax.block_until_ready(out)

    ref = reference(x, params, num_heads)
    assert out.shape == (N, output_dim), out.shape
    max_err = float(jnp.max(jnp.abs(out - ref)))
    assert jnp.allclose(out, ref, atol=5e-2, rtol=5e-2), max_err
    print("KERNEL_OK")
</pallas_src>

<mosaic_0001>
module attributes {stable_mosaic.version = 11 : i64} {
  func.func @attention_pool_kernel(%arg0: i32, %arg1: memref<2x16x32xbf16, #tpu.memory_space<vmem>>, %arg2: memref<64x32xbf16, #tpu.memory_space<vmem>>, %arg3: memref<32x32xbf16, #tpu.memory_space<vmem>>, %arg4: memref<64x32xbf16, #tpu.memory_space<vmem>>, %arg5: memref<1x32xf32, #tpu.memory_space<vmem>>, %arg6: memref<1x64xf32, #tpu.memory_space<vmem>>, %arg7: memref<16x64xf32, #tpu.memory_space<vmem>>, %arg8: memref<32x4xf32, #tpu.memory_space<vmem>>, %arg9: memref<4x32xf32, #tpu.memory_space<vmem>>, %arg10: memref<1x64xf32, #tpu.memory_space<vmem>>, %arg11: memref<2x64xf32, #tpu.memory_space<vmem>>) attributes {dimension_semantics = [#tpu.dimension_semantics<parallel>], iteration_bounds = array<i64: 1>, scalar_prefetch = 0 : i64, scratch_operands = 0 : i64, tpu.core_type = #tpu.core_type<tc>, window_params = [{transform_indices = @transform_0, window_bounds = array<i64: 2, 16, 32>}, {pipeline_mode = #tpu.pipeline_mode<synchronous>, transform_indices = @transform_1, window_bounds = array<i64: 64, 32>}, {pipeline_mode = #tpu.pipeline_mode<synchronous>, transform_indices = @transform_2, window_bounds = array<i64: 32, 32>}, {pipeline_mode = #tpu.pipeline_mode<synchronous>, transform_indices = @transform_3, window_bounds = array<i64: 64, 32>}, {pipeline_mode = #tpu.pipeline_mode<synchronous>, transform_indices = @transform_4, window_bounds = array<i64: 1, 32>}, {pipeline_mode = #tpu.pipeline_mode<synchronous>, transform_indices = @transform_5, window_bounds = array<i64: 1, 64>}, {pipeline_mode = #tpu.pipeline_mode<synchronous>, transform_indices = @transform_6, window_bounds = array<i64: 16, 64>}, {pipeline_mode = #tpu.pipeline_mode<synchronous>, transform_indices = @transform_7, window_bounds = array<i64: 32, 4>}, {pipeline_mode = #tpu.pipeline_mode<synchronous>, transform_indices = @transform_8, window_bounds = array<i64: 4, 32>}, {pipeline_mode = #tpu.pipeline_mode<synchronous>, transform_indices = @transform_9, window_bounds = array<i64: 1, 64>}, {transform_indices = @transform_10, window_bounds = array<i64: 2, 64>}]} {
    %c0 = arith.constant 0 : index
    %c0_0 = arith.constant 0 : index
    %c0_1 = arith.constant 0 : index
    %0 = vector.load %arg1[%c0, %c0_0, %c0_1] : memref<2x16x32xbf16, #tpu.memory_space<vmem>>, vector<2x16x32xbf16>
    %1 = vector.shape_cast %0 : vector<2x16x32xbf16> to vector<32x32xbf16>
    %c0_2 = arith.constant 0 : index
    %c0_3 = arith.constant 0 : index
    %2 = vector.load %arg2[%c0_2, %c0_3] : memref<64x32xbf16, #tpu.memory_space<vmem>>, vector<64x32xbf16>
    %cst = arith.constant dense<0.000000e+00> : vector<32x64xf32>
    %3 = tpu.matmul %1, %2, %cst {dimension_numbers = #tpu.dot_dimension_numbers<[1], [1], [0], [0], [0, 0, 1, 0], [], []>} : vector<32x32xbf16>, vector<64x32xbf16>, vector<32x64xf32> -> vector<32x64xf32>
    %4 = vector.shape_cast %3 : vector<32x64xf32> to vector<2x16x64xf32>
    %cst_4 = arith.constant dense<0.000000e+00> : vector<2x64xf32>
    %5 = vector.multi_reduction <add>, %4, %cst_4 [1] : vector<2x16x64xf32> to vector<2x64xf32>
    %cst_5 = arith.constant 1.600000e+01 : f32
    %6 = vector.broadcast %cst_5 : f32 to vector<2x64xf32>
    %7 = arith.divf %5, %6 : vector<2x64xf32>
    %c0_6 = arith.constant 0 : index
    %c0_7 = arith.constant 0 : index
    %8 = vector.load %arg7[%c0_6, %c0_7] : memref<16x64xf32, #tpu.memory_space<vmem>>, vector<16x64xf32>
    %9 = vector.shape_cast %8 : vector<16x64xf32> to vector<1x16x64xf32>
    %10 = vector.broadcast %9 : vector<1x16x64xf32> to vector<2x16x64xf32>
    %11 = arith.addf %4, %10 : vector<2x16x64xf32>
    %12 = vector.extract_strided_slice %11 {offsets = [0, 0, 0], sizes = [2, 16, 32], strides = [1, 1, 1]} : vector<2x16x64xf32> to vector<2x16x32xf32>
    %13 = vector.extract_strided_slice %11 {offsets = [0, 0, 32], sizes = [2, 16, 32], strides = [1, 1, 1]} : vector<2x16x64xf32> to vector<2x16x32xf32>
    %c0_8 = arith.constant 0 : index
    %c0_9 = arith.constant 0 : index
    %14 = vector.load %arg6[%c0_8, %c0_9] : memref<1x64xf32, #tpu.memory_space<vmem>>, vector<1x64xf32>
    %15 = vector.broadcast %14 : vector<1x64xf32> to vector<2x64xf32>
    %16 = arith.addf %7, %15 : vector<2x64xf32>
    %17 = vector.extract_strided_slice %16 {offsets = [0, 0], sizes = [2, 32], strides = [1, 1]} : vector<2x64xf32> to vector<2x32xf32>
    %18 = vector.extract_strided_slice %16 {offsets = [0, 32], sizes = [2, 32], strides = [1, 1]} : vector<2x64xf32> to vector<2x32xf32>
    %19 = arith.extf %0 : vector<2x16x32xbf16> to vector<2x16x32xf32>
    %cst_10 = arith.constant dense<0.000000e+00> : vector<2x32xf32>
    %20 = vector.multi_reduction <add>, %19, %cst_10 [1] : vector<2x16x32xf32> to vector<2x32xf32>
    %cst_11 = arith.constant 1.600000e+01 : f32
    %21 = vector.broadcast %cst_11 : f32 to vector<2x32xf32>
    %22 = arith.divf %20, %21 : vector<2x32xf32>
    %23 = arith.truncf %22 : vector<2x32xf32> to vector<2x32xbf16>
    %c0_12 = arith.constant 0 : index
    %c0_13 = arith.constant 0 : index
    %24 = vector.load %arg3[%c0_12, %c0_13] : memref<32x32xbf16, #tpu.memory_space<vmem>>, vector<32x32xbf16>
    %cst_14 = arith.constant dense<0.000000e+00> : vector<2x32xf32>
    %25 = tpu.matmul %23, %24, %cst_14 {dimension_numbers = #tpu.dot_dimension_numbers<[1], [1], [0], [0], [0, 0, 1, 0], [], []>} : vector<2x32xbf16>, vector<32x32xbf16>, vector<2x32xf32> -> vector<2x32xf32>
    %c0_15 = arith.constant 0 : index
    %c0_16 = arith.constant 0 : index
    %26 = vector.load %arg5[%c0_15, %c0_16] : memref<1x32xf32, #tpu.memory_space<vmem>>, vector<1x32xf32>
    %27 = vector.broadcast %26 : vector<1x32xf32> to vector<2x32xf32>
    %28 = arith.addf %25, %27 : vector<2x32xf32>
    %c0_17 = arith.constant 0 : index
    %c0_18 = arith.constant 0 : index
    %29 = vector.load %arg8[%c0_17, %c0_18] : memref<32x4xf32, #tpu.memory_space<vmem>>, vector<32x4xf32>
    %c0_19 = arith.constant 0 : index
    %c0_20 = arith.constant 0 : index
    %30 = vector.load %arg9[%c0_19, %c0_20] : memref<4x32xf32, #tpu.memory_space<vmem>>, vector<4x32xf32>
    %31 = vector.shape_cast %28 : vector<2x32xf32> to vector<2x1x32xf32>
    %32 = vector.broadcast %31 : vector<2x1x32xf32> to vector<2x16x32xf32>
    %33 = arith.mulf %12, %32 : vector<2x16x32xf32>
    %34 = vector.shape_cast %33 : vector<2x16x32xf32> to vector<32x32xf32>
    %cst_21 = arith.constant dense<0.000000e+00> : vector<32x4xf32>
    %35 = tpu.matmul %34, %29, %cst_21 {dimension_numbers = #tpu.dot_dimension_numbers<[1], [0], [0], [1], [0, 0, 1, 1], [], []>} : vector<32x32xf32>, vector<32x4xf32>, vector<32x4xf32> -> vector<32x4xf32>
    %36 = vector.shape_cast %35 : vector<32x4xf32> to vector<2x16x4xf32>
    %37 = arith.mulf %28, %17 : vector<2x32xf32>
    %cst_22 = arith.constant dense<0.000000e+00> : vector<2x4xf32>
    %38 = tpu.matmul %37, %29, %cst_22 {dimension_numbers = #tpu.dot_dimension_numbers<[1], [0], [0], [1], [0, 0, 1, 1], [], []>} : vector<2x32xf32>, vector<32x4xf32>, vector<2x4xf32> -> vector<2x4xf32>
    %cst_23 = arith.constant dense<0xFF800000> : vector<2x4xf32>
    %39 = vector.multi_reduction <maximumf>, %36, %cst_23 [1] : vector<2x16x4xf32> to vector<2x4xf32>
    %40 = arith.maximumf %39, %38 : vector<2x4xf32>
    %41 = vector.shape_cast %40 : vector<2x4xf32> to vector<2x1x4xf32>
    %42 = vector.broadcast %41 : vector<2x1x4xf32> to vector<2x16x4xf32>
    %43 = arith.subf %36, %42 : vector<2x16x4xf32>
    %44 = math.exp %43 : vector<2x16x4xf32>
    %45 = arith.subf %38, %40 : vector<2x4xf32>
    %46 = math.exp %45 : vector<2x4xf32>
    %cst_24 = arith.constant dense<0.000000e+00> : vector<2x4xf32>
    %47 = vector.multi_reduction <add>, %44, %cst_24 [1] : vector<2x16x4xf32> to vector<2x4xf32>
    %48 = arith.addf %46, %47 : vector<2x4xf32>
    %49 = tpu.reciprocal %48 {approx = true} : vector<2x4xf32> -> vector<2x4xf32>
    %50 = vector.shape_cast %44 : vector<2x16x4xf32> to vector<32x4xf32>
    %cst_25 = arith.constant dense<0.000000e+00> : vector<32x32xf32>
    %51 = tpu.matmul %50, %30, %cst_25 {dimension_numbers = #tpu.dot_dimension_numbers<[1], [0], [0], [1], [0, 0, 1, 1], [], []>} : vector<32x4xf32>, vector<4x32xf32>, vector<32x32xf32> -> vector<32x32xf32>
    %52 = vector.shape_cast %51 : vector<32x32xf32> to vector<2x16x32xf32>
    %cst_26 = arith.constant dense<0.000000e+00> : vector<2x32xf32>
    %53 = tpu.matmul %46, %30, %cst_26 {dimension_numbers = #tpu.dot_dimension_numbers<[1], [0], [0], [1], [0, 0, 1, 1], [], []>} : vector<2x4xf32>, vector<4x32xf32>, vector<2x32xf32> -> vector<2x32xf32>
    %54 = arith.mulf %53, %18 : vector<2x32xf32>
    %55 = arith.mulf %52, %13 : vector<2x16x32xf32>
    %cst_27 = arith.constant dense<0.000000e+00> : vector<2x32xf32>
    %56 = vector.multi_reduction <add>, %55, %cst_27 [1] : vector<2x16x32xf32> to vector<2x32xf32>
    %57 = arith.addf %54, %56 : vector<2x32xf32>
    %cst_28 = arith.constant dense<0.000000e+00> : vector<2x32xf32>
    %58 = tpu.matmul %49, %30, %cst_28 {dimension_numbers = #tpu.dot_dimension_numbers<[1], [0], [0], [1], [0, 0, 1, 1], [], []>} : vector<2x4xf32>, vector<4x32xf32>, vector<2x32xf32> -> vector<2x32xf32>
    %59 = arith.mulf %57, %58 : vector<2x32xf32>
    %60 = arith.truncf %59 : vector<2x32xf32> to vector<2x32xbf16>
    %c0_29 = arith.constant 0 : index
    %c0_30 = arith.constant 0 : index
    %61 = vector.load %arg4[%c0_29, %c0_30] : memref<64x32xbf16, #tpu.memory_space<vmem>>, vector<64x32xbf16>
    %cst_31 = arith.constant dense<0.000000e+00> : vector<2x64xf32>
    %62 = tpu.matmul %60, %61, %cst_31 {dimension_numbers = #tpu.dot_dimension_numbers<[1], [1], [0], [0], [0, 0, 1, 0], [], []>} : vector<2x32xbf16>, vector<64x32xbf16>, vector<2x64xf32> -> vector<2x64xf32>
    %c0_32 = arith.constant 0 : index
    %c0_33 = arith.constant 0 : index
    %63 = vector.load %arg10[%c0_32, %c0_33] : memref<1x64xf32, #tpu.memory_space<vmem>>, vector<1x64xf32>
    %64 = vector.broadcast %63 : vector<1x64xf32> to vector<2x64xf32>
    %65 = arith.addf %62, %64 : vector<2x64xf32>
    %c0_34 = arith.constant 0 : index
    %c0_35 = arith.constant 0 : index
    %66 = vector.load %arg11[%c0_34, %c0_35] : memref<2x64xf32, #tpu.memory_space<vmem>>, vector<2x64xf32>
    tpu.vector_store %arg11[%c0_34, %c0_35], %65 {strides = array<i32>} : memref<2x64xf32, #tpu.memory_space<vmem>>, vector<2x64xf32>,
    return
  }
  func.func @transform_0(%arg0: i32) -> (i32, i32, i32) {
    %c0_i32 = arith.constant 0 : i32
    %c0_i32_0 = arith.constant 0 : i32
    %c0_i32_1 = arith.constant 0 : i32
    return %arg0, %c0_i32, %c0_i32_0 : i32, i32, i32
  }
  func.func @transform_1(%arg0: i32) -> (i32, i32) {
    %c0_i32 = arith.constant 0 : i32
    %c0_i32_0 = arith.constant 0 : i32
    %c0_i32_1 = arith.constant 0 : i32
    return %c0_i32, %c0_i32_0 : i32, i32
  }
  func.func @transform_2(%arg0: i32) -> (i32, i32) {
    %c0_i32 = arith.constant 0 : i32
    %c0_i32_0 = arith.constant 0 : i32
    %c0_i32_1 = arith.constant 0 : i32
    return %c0_i32, %c0_i32_0 : i32, i32
  }
  func.func @transform_3(%arg0: i32) -> (i32, i32) {
    %c0_i32 = arith.constant 0 : i32
    %c0_i32_0 = arith.constant 0 : i32
    %c0_i32_1 = arith.constant 0 : i32
    return %c0_i32, %c0_i32_0 : i32, i32
  }
  func.func @transform_4(%arg0: i32) -> (i32, i32) {
    %c0_i32 = arith.constant 0 : i32
    %c0_i32_0 = arith.constant 0 : i32
    %c0_i32_1 = arith.constant 0 : i32
    return %c0_i32, %c0_i32_0 : i32, i32
  }
  func.func @transform_5(%arg0: i32) -> (i32, i32) {
    %c0_i32 = arith.constant 0 : i32
    %c0_i32_0 = arith.constant 0 : i32
    %c0_i32_1 = arith.constant 0 : i32
    return %c0_i32, %c0_i32_0 : i32, i32
  }
  func.func @transform_6(%arg0: i32) -> (i32, i32) {
    %c0_i32 = arith.constant 0 : i32
    %c0_i32_0 = arith.constant 0 : i32
    %c0_i32_1 = arith.constant 0 : i32
    return %c0_i32, %c0_i32_0 : i32, i32
  }
  func.func @transform_7(%arg0: i32) -> (i32, i32) {
    %c0_i32 = arith.constant 0 : i32
    %c0_i32_0 = arith.constant 0 : i32
    %c0_i32_1 = arith.constant 0 : i32
    return %c0_i32, %c0_i32_0 : i32, i32
  }
  func.func @transform_8(%arg0: i32) -> (i32, i32) {
    %c0_i32 = arith.constant 0 : i32
    %c0_i32_0 = arith.constant 0 : i32
    %c0_i32_1 = arith.constant 0 : i32
    return %c0_i32, %c0_i32_0 : i32, i32
  }
  func.func @transform_9(%arg0: i32) -> (i32, i32) {
    %c0_i32 = arith.constant 0 : i32
    %c0_i32_0 = arith.constant 0 : i32
    %c0_i32_1 = arith.constant 0 : i32
    return %c0_i32, %c0_i32_0 : i32, i32
  }
  func.func @transform_10(%arg0: i32) -> (i32, i32) {
    %c0_i32 = arith.constant 0 : i32
    %c0_i32_0 = arith.constant 0 : i32
    return %arg0, %c0_i32 : i32, i32
  }
}

</mosaic_0001>

<bundles_post_ra>
// kernel: tpu_custom_call.1
= control target key start
LH: loop header
LB: loop body
LE: loop exit
PB: predicated region body
PF: predicated region fallthrough
CT: control target
= control target key end

     0   :  { %vm79_vm0 = vcmask 261120   ;;  %s1431_s0 = inlined_call_operand.vmem [shape: bf16[2,16,32], index: 0, kind: input, shape index: {}]   ;;  %s1432_s1 = inlined_call_operand.vmem [shape: bf16[64,32], index: 1, kind: input, shape index: {}]   ;;  %s1433_s2 = inlined_call_operand.vmem [shape: bf16[32,32], index: 2, kind: input, shape index: {}]   ;;  %s1434_s3 = inlined_call_operand.vmem [shape: bf16[64,32], index: 3, kind: input, shape index: {}]   ;;  %s1435_s4 = inlined_call_operand.vmem [shape: f32[1,32], index: 4, kind: input, shape index: {}]   ;;  %s1436_s5 = inlined_call_operand.vmem [shape: f32[1,64], index: 5, kind: input, shape index: {}]   ;;  %s1437_s6 = inlined_call_operand.vmem [shape: f32[16,64], index: 6, kind: input, shape index: {}]   ;;  %s1438_s7 = inlined_call_operand.vmem [shape: f32[32,4], index: 7, kind: input, shape index: {}]   ;;  %s1439_s8 = inlined_call_operand.vmem [shape: f32[4,32], index: 8, kind: input, shape index: {}]   ;;  %s1440_s9 = inlined_call_operand.vmem [shape: f32[1,64], index: 9, kind: input, shape index: {}]   ;;  %s1441_s10 = inlined_call_operand.hbm [shape: f32[2,64], index: 10, kind: output, shape index: {}]  }
   0x1   :  { %v1137_v0 = vld [vmem:[%s1432_s1 + $0x18] sm:$0xff]   ;;  %v1138_v1 = vld [vmem:[%s1432_s1 + $0x10] sm:$0xff]   ;;  %v37_v3 = vld [vmem:[%s1431_s0] sm:$0xff]  }
   0x2   :  { %1128 = vmatprep.subr.msk.bf16.mxu0 %vm79_vm0, %v1137_v0  ;;  %v96_v2 = vsel %vm79_vm0, %v1137_v0, 0  ;;  %v39_v4 = vld [vmem:[%s1431_s0 + $0x8] sm:$0xff]   ;;  %v184_v5 = vunpack.c.l.bf16 %v37_v3  ;;  %v185_v6 = vunpack.c.h.bf16 %v37_v3  ;;  %1061 = vmatprep.mubr.msk.bf16.mxu0 %vm79_vm0, %v37_v3  ;;  %v93_v11 = vsel %vm79_vm0, %v1138_v1, 0 }
   0x3   :  { %1054 = vmatpush3.bf16.xpose.msra.mxu0 %v96_v2  ;;  %v186_v7 = vunpack.c.l.bf16 %v39_v4  ;;  %v187_v8 = vunpack.c.h.bf16 %v39_v4  ;;  %v1139_v12 = vld [vmem:[%s1432_s1 + $0x8] sm:$0xff]  }
   0x4   :  { %1129 = vmatprep.subr.msk.bf16.mxu0 %vm79_vm0, %v1138_v1  ;;  %v188_v9 = vsel %vm79_vm0, %v184_v5, 0.0  ;;  %v189_v10 = vsel %vm79_vm0, %v185_v6, 0.0 }
   0x5   :  { %v190_v13 = vadd.f32 %v189_v10, %v188_v9  ;;  %v197_v14 = vsel %vm79_vm0, %v186_v7, 0.0  ;;  %v198_v15 = vsel %vm79_vm0, %v187_v8, 0.0 }
   0x6   :  { %v199_v16 = vadd.f32 %v198_v15, %v197_v14 }
   0x7   :  { %v191_v17 = vrot.slane %v190_v13, 4 }
   0x8   :  { %v200_v18 = vrot.slane %v199_v16, 4 }
   0xb   :  { %1056 = vmatpush3.bf16.xpose.msra.mxu0 %v93_v11 }
   0xc   :  { %15 = vsyncpa [#allocation3], 0  ;;  %1130 = vmatprep.subr.msk.bf16.mxu0 %vm79_vm0, %v1139_v12  ;;  %v192_v19 = vadd.f32 %v191_v17, %v190_v13  ;;  %v201_v20 = vadd.f32 %v200_v18, %v199_v16  ;;  %v90_v23 = vsel %vm79_vm0, %v1139_v12, 0  ;;  %v1140_v24 = vld [vmem:[%s1432_s1] sm:$0xff]   ;;  %v1185_v32 = vmov 0.0   ;;  %v1143_v33 = vld [vmem:[%s1433_s2 + $0x8] sm:$0xff]  }
   0xd   :  { %v87_v29 = vsel %vm79_vm0, %v1140_v24, 0  ;;  %v245_v36 = vsel %vm79_vm0, %v1143_v33, 0  ;;  %vm1186_vm1 = vmmov 0   ;;  %v1144_v39 = vld [vmem:[%s1433_s2] sm:$0xff]   ;;  %vm225_vm2 = vcmask 1041409   ;;  %v1297_v45 = vld [vmem:[%s1438_s7 + $0x18] sm:$0xff] }
   0xe   :  { %v193_v21 = vrot.slane %v192_v19, 2  ;;  %v202_v22 = vrot.slane %v201_v20, 2  ;;  %v242_v42 = vsel %vm79_vm0, %v1144_v39, 0  ;;  %1073 = vmatprep.subr.mxu1 %v1297_v45  ;;  %v1304_v46 = vld [vmem:[%s1438_s7 + $0x10] sm:$0xff]  ;;  %v1311_v47 = vld [vmem:[%s1438_s7 + $0x8] sm:$0xff]  ;;  %v1318_v48 = vld [vmem:[%s1438_s7] sm:$0xff]  ;;  %v296_v2 = vlaneseq }
   0xf   :  { %1074 = vmatpush3.msra.mxu1 %v1297_v45  ;;  %v169_v49 = vld [vmem:[%s1437_s6] sm:$0xff]  ;;  %vm147_vm3 = vcmask 523264   ;;  %v170_v53 = vld [vmem:[%s1437_s6 + $0x8] sm:$0xff]  ;;  %s1187_s7 = smov 96   ;;  %v1188_v61 = vmov 1966171168  }
  0x10   :  { %v194_v25 = vadd.f32 %v193_v21, %v192_v19  ;;  %v203_v26 = vadd.f32 %v202_v22, %v201_v20  ;;  %1075 = vmatprep.subr.mxu1 %v1304_v46  ;;  %v294_v62 = vunpack.c.l.s4 %v1188_v61  ;;  %v297_v8 = vshrl.u32 %v296_v2, 7  ;;  %v993_v13 = vld [vmem:[%s1435_s4] ss:$0 sm:$0xff]  ;;  %s1189_s27 = smov [#allocation2]  }
  0x11   :  { %1076 = vmatpush3.msra.mxu1 %v1304_v46  ;;  %vm594_vm4 = vcmask 1043456   ;;  %vm505_vm5 = vcmask 31744   ;;  %s976_s28 = sshll.u32 %s1189_s27, 4  ;;  %vm968_vm6 = vcmask 517120   ;;  %s977_s28 = int_to_ptr.vmem [resolvable:$true] %s976_s28 }
  0x12   :  { %v195_v27 = vrot.slane %v194_v25, 1  ;;  %v204_v28 = vrot.slane %v203_v26, 1  ;;  %1077 = vmatprep.subr.mxu1 %v1311_v47  ;;  %v295_v7 = vunpack.c.0.s8 %v294_v62  ;;  %s1163_s2 = scalar_lea.vmem %s977_s28, 32  ;;  %p1168_p1 = scmp.lt.s32.totalorder %s977_s28, %s977_s28 }
  0x13   :  { %1058 = vmatpush3.bf16.xpose.msra.mxu0 %v90_v23  ;;  %1078 = vmatpush3.msra.mxu1 %v1311_v47  ;;  %v1340_v23 = vsub.s32 0, %v297_v8  ;;  %p1164_p0 = scmp.ne.s32.totalorder %s977_s28, %s1163_s2  ;;  %p1169_p2 = scmp.lt.s32.totalorder %s1163_s2, %s1163_s2 }
  0x14   :  { %1131 = vmatprep.subr.msk.bf16.mxu0 %vm79_vm0, %v1140_v24  ;;  %v196_v30 = vadd.f32 %v195_v27, %v194_v25  ;;  %v205_v31 = vadd.f32 %v204_v28, %v203_v26  ;;  %1079 = vmatprep.subr.mxu1 %v1318_v48  ;;  %v298_v14 = vsub.s32 %v295_v7, %v297_v8  ;;  %v992_v24 = vld [vmem:[%s1436_s5] ss:$0 sm:$0xff] }
  0x15   :  { %1080 = vmatpush3.msra.mxu1 %v1318_v48  ;;  %p1170_p3 = por %p1169_p2, %p1168_p1 }
  0x16   :  { %v206_v34 = vmul.f32 0.0625, %v196_v30  ;;  %v207_v35 = vmul.f32 0.0625, %v205_v31  ;;  %1087 = vmatprep.subr.mxu1 %v1185_v32 }
  0x17   :  { %p1171_p4 = pnand %p1170_p3, %p1164_p0 }
  0x18   :  { %v208_v37 = vpack.c.bf16 %v206_v34, %v206_v34  ;;  %v209_v38 = vpack.c.bf16 %v207_v35, %v207_v35 }
  0x1a   :  { %v223_v40 = vunpack.c.l.b16 %v208_v37  ;;  %v224_v41 = vunpack.c.l.b16 %v209_v38 }
  0x1b   :  { %1060 = vmatpush3.bf16.xpose.msra.mxu0 %v87_v29 }
  0x1c   :  { %1065 = vmatprep.subr.bf16.mxu0 %v1185_v32  ;;  %v226_v43 = vsel %vm225_vm2, %v224_v41, %v223_v40 }
  0x1d   :  { %v227_v44 = vpack.c.b16 %v226_v43, %v226_v43 }
  0x22   :  { %1062 = vmatmul.mubr.msk.bf16.vlgmr.msra.gmra.mxu0 %vm79_vm0, %v39_v4 }
  0x23   :  { %1066 = vmatpush3.bf16.xpose.msra.mxu0 %v245_v36  ;;  %1069 = vmatprep.mubr.msk.bf16.mxu0 %vm1186_vm1, %v1185_v32 }
  0x24   :  { %1067 = vmatprep.subr.bf16.mxu0 %v1185_v32 }
  0x2b   :  { %1068 = vmatpush3.bf16.xpose.msra.mxu0 %v242_v42 }
  0x2c   :  { %1106 = vmatprep.subr.mxu0 %v1185_v32 }
  0x32   :  { %1070 = vmatmul.mubr.msk.bf16.vlgmr.msra.gmra.mxu0 %vm79_vm0, %v227_v44 }
  0x33   :  { %1108 = vmatprep.mubr.msk.f32.mxu0 %vm1186_vm1, %v1185_v32 }
  0xe2   :  { %v1063_v50 = vpop.f32.mrf.mxu0 }
  0xe3   :  { %v173_v51 = vadd.f32 %v1063_v50, %v169_v49  ;;  %v157_v56 = vsel %vm147_vm3, %v1063_v50, 0.0 }
  0xe4   :  { %v132_v52 = vpop.f32.mrf.mxu0 }
  0xe5   :  { %768 = vrot.lane.b32.xlu1 %v173_v51, %s1187_s7  ;;  %v171_v54 = vadd.f32 %v169_v49, %v132_v52  ;;  %v148_v63 = vsel %vm147_vm3, %v132_v52, 0.0 }
  0xe6   :  { %v1064_v55 = vpop.f32.mrf.mxu0 }
  0xe7   :  { %v158_v57 = vsel %vm147_vm3, %v1064_v55, 0.0  ;;  %v174_v58 = vadd.f32 %v1064_v55, %v170_v53  ;;  %764 = vrot.lane.b32.xlu0 %v171_v54, %s1187_s7 }
  0xe8   :  { %v159_v59 = vadd.f32 %v158_v57, %v157_v56  ;;  %v135_v60 = vpop.f32.mrf.mxu0 }
  0xe9   :  { %v149_v0 = vsel %vm147_vm3, %v135_v60, 0.0  ;;  %v172_v1 = vadd.f32 %v170_v53, %v135_v60  ;;  %770 = vrot.lane.b32.xlu1 %v174_v58, %s1187_s7 }
  0xea   :  { %v160_v3 = vrot.slane %v159_v59, 4  ;;  %v150_v4 = vadd.f32 %v149_v0, %v148_v63 }
  0xeb   :  { %766 = vrot.lane.b32.xlu0 %v172_v1, %s1187_s7 }
  0xec   :  { %v161_v5 = vadd.f32 %v160_v3, %v159_v59  ;;  %v151_v6 = vrot.slane %v150_v4, 4 }
  0xee   :  { %v162_v9 = vrot.slane %v161_v5, 2  ;;  %v152_v10 = vadd.f32 %v151_v6, %v150_v4 }
  0xf0   :  { %v163_v11 = vadd.f32 %v162_v9, %v161_v5  ;;  %v153_v12 = vrot.slane %v152_v10, 2 }
  0xf2   :  { %v164_v15 = vrot.slane %v163_v11, 1  ;;  %v154_v16 = vadd.f32 %v153_v12, %v152_v10  ;;  %v281_v17 = vpop.f32.mrf.mxu0 }
  0xf3   :  { %v282_v18 = vadd.f32 %v993_v13, %v281_v17 }
  0xf4   :  { %v165_v19 = vadd.f32 %v164_v15, %v163_v11  ;;  %v155_v20 = vrot.slane %v154_v16, 1  ;;  %v1071_v21 = vpop.f32.mrf.mxu0 }
  0xf5   :  { %v299_v22 = vrot.slane %v282_v18, %v298_v14 }
  0xf6   :  { %v284_v25 = vpop.f32.mrf.mxu0  ;;  %v156_v26 = vadd.f32 %v155_v20, %v154_v16  ;;  %v168_v27 = vmul.f32 0.0625, %v165_v19 }
  0xf7   :  { %v300_v28 = vcombine.high %v299_v22, %v299_v22  ;;  %v307_v29 = vrot.slane %v299_v22, %v298_v14 }
  0xf8   :  { %v1072_v30 = vpop.f32.mrf.mxu0  ;;  %v167_v31 = vmul.f32 0.0625, %v156_v26  ;;  %v183_v33 = vadd.f32 %v992_v24, %v168_v27 }
  0xf9   :  { %v314_v34 = vrot.slane %v300_v28, %v298_v14  ;;  %v318_v35 = vrot.slane %v307_v29, %v1340_v23 }
  0xfa   :  { %v182_v36 = vadd.f32 %v992_v24, %v167_v31  ;;  %v428_v37 = vrot.slane %v183_v33, 7 }
  0xfb   :  { %v322_v38 = vrot.slane %v314_v34, %v1340_v23  ;;  %v325_v39 = vmul.f32 %v318_v35, %v171_v54  ;;  %v326_v40 = vmul.f32 %v318_v35, %v172_v1 }
  0xfc   :  { %v429_v41 = vsel %vm225_vm2, %v428_v37, %v182_v36 }
  0xfd   :  { %1081 = vmatprep.mubr.msk.f32.mxu1 %vm79_vm0, %v325_v39  ;;  %756 = vrot.lane.b32.xlu0 %v429_v41, %s1187_s7  ;;  %v327_v42 = vmul.f32 %v322_v38, %v173_v51  ;;  %v328_v43 = vmul.f32 %v322_v38, %v174_v58  ;;  %v431_v44 = vmul.f32 %v429_v41, %v282_v18 }
  0xfe   :  { %1082 = vmatmul.mubr.msk.f32.vlgmr.msra.gmra.mxu1 %vm79_vm0, %v326_v40 }
  0xff   :  { %1084 = vmatprep.mubr.msk.f32.mxu1 %vm79_vm0, %v327_v42  ;;  %1088 = vmatpush3.msra.mxu1 %v1297_v45  ;;  %v1366_v45 = vld [vmem:[%s1439_s8] sm:$0xf] }
 0x100   :  { %1089 = vmatprep.subr.mxu1 %v1185_v32  ;;  %1107 = vmatpush3.msk.msra.mxu0 %vm594_vm4, %v1366_v45 }
 0x101   :  { %1090 = vmatpush3.msra.mxu1 %v1304_v46  ;;  %1111 = vmatprep.subr.mxu0 %v1185_v32 }
 0x102   :  { %1085 = vmatmul.mubr.msk.f32.gmra.mxu1 %vm79_vm0, %v328_v43  ;;  %1091 = vmatprep.subr.mxu1 %v1185_v32 }
 0x103   :  { %1092 = vmatpush3.msra.mxu1 %v1311_v47  ;;  %1095 = vmatprep.mubr.msk.f32.mxu1 %vm1186_vm1, %v1185_v32 }
 0x104   :  { %1093 = vmatprep.subr.mxu1 %v1185_v32 }
 0x105   :  { %1094 = vmatpush3.msra.mxu1 %v1318_v48 }
 0x106   :  { %1096 = vmatmul.mubr.msk.f32.vlgmr.msra.gmra.mxu1 %vm79_vm0, %v431_v44  ;;  %1098 = vmatprep.subr.msk.mxu1 %vm594_vm4, %v1366_v45 }
 0x107   :  { %1099 = vmatpush3.msk.msra.mxu1 %vm594_vm4, %v1366_v45 }
 0x108   :  { %1116 = vmatprep.subr.bf16.mxu1 %v1185_v32 }
 0x1be   :  { %v1083_v46 = vpop.f32.mrf.mxu1 }
 0x1bf   :  { %v507_v48 = vsel %vm505_vm5, %v1083_v46, -inf }
 0x1c0   :  { %v407_v47 = vpop.f32.mrf.mxu1 }
 0x1c1   :  { %v506_v49 = vsel %vm505_vm5, %v407_v47, -inf }
 0x1c2   :  { %v508_v50 = vmax.f32 %v506_v49, %v507_v48  ;;  %v1086_v51 = vpop.f32.mrf.mxu1 }
 0x1c3   :  { %v516_v54 = vsel %vm505_vm5, %v1086_v51, -inf }
 0x1c4   :  { %v509_v52 = vrot.slane %v508_v50, 4  ;;  %v417_v53 = vpop.f32.mrf.mxu1 }
 0x1c5   :  { %v515_v55 = vsel %vm505_vm5, %v417_v53, -inf }
 0x1c6   :  { %v510_v56 = vmax.f32 %v508_v50, %v509_v52  ;;  %v517_v57 = vmax.f32 %v515_v55, %v516_v54  ;;  %v501_v58 = vpop.f32.mrf.mxu1  ;;  %v1146_v52 = vld [vmem:[%s1434_s3 + $0x10] sm:$0xff]   ;;  %v1147_v54 = vld [vmem:[%s1434_s3 + $0x8] sm:$0xff]  }
 0x1c7   :  { %v525_v7 = vrot.slane %v501_v58, 1  ;;  %v920_v55 = vsel %vm79_vm0, %v1147_v54, 0 }
 0x1c8   :  { %v511_v59 = vrot.slane %v510_v56, 2  ;;  %v518_v60 = vrot.slane %v517_v57, 4  ;;  %v1097_v61 = vpop.f32.mrf.mxu1 }
 0x1ca   :  { %v512_v62 = vmax.f32 %v510_v56, %v511_v59  ;;  %v519_v63 = vmax.f32 %v517_v57, %v518_v60  ;;  %v1148_v56 = vld [vmem:[%s1434_s3] sm:$0xff]   ;;  %v769_v59 = vpop.permute.xlu1 %768 }
 0x1cb   :  { %v917_v57 = vsel %vm79_vm0, %v1148_v56, 0 }
 0x1cc   :  { %v520_v0 = vrot.slane %v519_v63, 2  ;;  %v513_v1 = vrot.slane %v512_v62, 1 }
 0x1ce   :  { %v521_v2 = vmax.f32 %v519_v63, %v520_v0  ;;  %v514_v3 = vmax.f32 %v512_v62, %v513_v1  ;;  %v771_v1 = vpop.permute.xlu1 %770 }
 0x1d0   :  { %v522_v4 = vrot.slane %v521_v2, 1  ;;  %v528_v5 = vmax.f32 %v514_v3, %v501_v58 }
 0x1d2   :  { %v523_v6 = vmax.f32 %v521_v2, %v522_v4  ;;  %v533_v8 = vrot.slane %v528_v5, %v1340_v23 }
 0x1d4   :  { %v529_v9 = vmax.f32 %v523_v6, %v525_v7  ;;  %v538_v10 = vsub.f32 %v407_v47, %v533_v8  ;;  %v539_v11 = vsub.f32 %v1083_v46, %v533_v8 }
 0x1d6   :  { %v537_v12 = vrot.slane %v529_v9, %v1340_v23  ;;  %v542_v13 = vmul.f32 1.442695, %v538_v10  ;;  %v544_v14 = vmul.f32 1.442695, %v539_v11  ;;  %v552_v15 = vrot.slane %v529_v9, 7 }
 0x1d8   :  { %v540_v16 = vsub.f32 %v417_v53, %v537_v12  ;;  %v541_v17 = vsub.f32 %v1086_v51, %v537_v12  ;;  %1151 = vpow2.f32 %v542_v13  ;;  %v553_v18 = vsel %vm225_vm2, %v552_v15, %v528_v5 }
 0x1d9   :  { %1153 = vpow2.f32 %v544_v14  ;;  %v555_v19 = vsub.f32 %v501_v58, %v553_v18  ;;  %v923_v53 = vsel %vm79_vm0, %v1146_v52, 0  ;;  %v765_v58 = vpop.permute.xlu0 %764 }
 0x1da   :  { %v546_v20 = vmul.f32 1.442695, %v540_v16  ;;  %v548_v21 = vmul.f32 1.442695, %v541_v17 }
 0x1db   :  { %v556_v22 = vmul.f32 1.442695, %v555_v19 }
 0x1dc   :  { %1155 = vpow2.f32 %v546_v20 }
 0x1dd   :  { %1157 = vpow2.f32 %v548_v21  ;;  %v767_v60 = vpop.permute.xlu0 %766 }
 0x1de   :  { %1159 = vpow2.f32 %v556_v22 }
 0x1e5   :  { %v1152_v24 = vpop.eup %1151 }
 0x1e6   :  { %v1154_v25 = vpop.eup %1153  ;;  %v558_v23 = vsel %vm505_vm5, %v1152_v24, 0.0  ;;  %1100 = vmatprep.mubr.msk.f32.mxu1 %vm505_vm5, %v1152_v24 }
 0x1e7   :  { %v559_v26 = vsel %vm505_vm5, %v1154_v25, 0.0  ;;  %1101 = vmatmul.mubr.msk.f32.vlgmr.msra.gmra.mxu1 %vm505_vm5, %v1154_v25 }
 0x1e8   :  { %v560_v27 = vadd.f32 %v559_v26, %v558_v23  ;;  %v757_v23 = vpop.permute.xlu0 %756 }
 0x1e9   :  { %v1156_v28 = vpop.eup %1155 }
 0x1ea   :  { %v1158_v29 = vpop.eup %1157  ;;  %v561_v30 = vrot.slane %v560_v27, 4  ;;  %v567_v31 = vsel %vm505_vm5, %v1156_v28, 0.0  ;;  %1103 = vmatprep.mubr.msk.f32.mxu1 %vm505_vm5, %v1156_v28 }
 0x1eb   :  { %v1160_v33 = vpop.eup %1159  ;;  %v568_v34 = vsel %vm505_vm5, %v1158_v29, 0.0  ;;  %1104 = vmatmul.mubr.msk.f32.gmra.mxu1 %vm505_vm5, %v1158_v29 }
 0x1ec   :  { %v562_v35 = vadd.f32 %v561_v30, %v560_v27  ;;  %v569_v36 = vadd.f32 %v568_v34, %v567_v31  ;;  %1109 = vmatmul.mubr.msk.f32.vlgmr.msra.gmra.mxu0 %vm505_vm5, %v1160_v33  ;;  %1124 = vmatprep.mubr.msk.bf16.mxu1 %vm1186_vm1, %v1185_v32  ;;  %v1011_v34 = vld [vmem:[%s1440_s9] ss:$0 sm:$0xff] }
 0x1ed   :  { %1112 = vmatpush3.msk.msra.mxu0 %vm594_vm4, %v1366_v45  ;;  %1113 = vmatprep.mubr.msk.f32.mxu0 %vm1186_vm1, %v1185_v32  ;;  %v1145_v45 = vld [vmem:[%s1434_s3 + $0x18] sm:$0xff]  }
 0x1ee   :  { %v563_v37 = vrot.slane %v562_v35, 2  ;;  %v570_v38 = vrot.slane %v569_v36, 4  ;;  %v926_v51 = vsel %vm79_vm0, %v1145_v45, 0 }
 0x1ef   :  { %1117 = vmatpush3.bf16.xpose.msra.mxu1 %v926_v51 }
 0x1f0   :  { %v564_v39 = vadd.f32 %v563_v37, %v562_v35  ;;  %v571_v40 = vadd.f32 %v570_v38, %v569_v36  ;;  %1118 = vmatprep.subr.bf16.mxu1 %v1185_v32 }
 0x1f2   :  { %v572_v41 = vrot.slane %v571_v40, 2  ;;  %v565_v42 = vrot.slane %v564_v39, 1 }
 0x1f4   :  { %v573_v43 = vadd.f32 %v572_v41, %v571_v40  ;;  %v566_v46 = vadd.f32 %v565_v42, %v564_v39 }
 0x1f6   :  { %v574_v44 = vrot.slane %v573_v43, 1 }
 0x1f7   :  { %1119 = vmatpush3.bf16.xpose.msra.mxu1 %v923_v53 }
 0x1f8   :  { %v575_v47 = vadd.f32 %v574_v44, %v573_v43  ;;  %1120 = vmatprep.subr.bf16.mxu1 %v1185_v32 }
 0x1fa   :  { %v578_v48 = vsel %vm225_vm2, %v575_v47, %v566_v46 }
 0x1fb   :  { %v580_v49 = vadd.f32 %v1160_v33, %v578_v48 }
 0x1fd   :  { %1161 = vrcp.f32 %v580_v49 }
 0x1ff   :  { %1121 = vmatpush3.bf16.xpose.msra.mxu1 %v920_v55 }
 0x200   :  { %1122 = vmatprep.subr.bf16.mxu1 %v1185_v32 }
 0x207   :  { %1123 = vmatpush3.bf16.xpose.msra.mxu1 %v917_v57 }
 0x20a   :  { %v1162_v50 = vpop.eup %1161 }
 0x20b   :  { %1114 = vmatmul.mubr.msk.f32.vlgmr.msra.gmra.mxu0 %vm505_vm5, %v1162_v50 }
 0x2a7   :  { %v1102_v61 = vpop.f32.mrf.mxu1 }
 0x2a8   :  { %v777_v62 = vmul.f32 %v1102_v61, %v767_v60 }
 0x2a9   :  { %v664_v63 = vpop.f32.mrf.mxu1 }
 0x2aa   :  { %v776_v0 = vmul.f32 %v765_v58, %v664_v63  ;;  %v781_v3 = vsel %vm79_vm0, %v777_v62, 0.0 }
 0x2ab   :  { %v1105_v2 = vpop.f32.mrf.mxu1 }
 0x2ac   :  { %v780_v32 = vsel %vm79_vm0, %v776_v0, 0.0  ;;  %v779_v4 = vmul.f32 %v1105_v2, %v771_v1  ;;  %v752_v5 = vpop.f32.mrf.mxu0 }
 0x2ad   :  { %v782_v6 = vadd.f32 %v781_v3, %v780_v32  ;;  %v674_v7 = vpop.f32.mrf.mxu1  ;;  %v759_v27 = vmul.f32 %v757_v23, %v752_v5 }
 0x2ae   :  { %v778_v8 = vmul.f32 %v769_v59, %v674_v7  ;;  %v1110_v9 = vpop.f32.mrf.mxu0  ;;  %v790_v10 = vsel %vm79_vm0, %v779_v4, 0.0 }
 0x2af   :  { %v783_v12 = vrot.slane %v782_v6, 4 }
 0x2b0   :  { %v789_v11 = vsel %vm79_vm0, %v778_v8, 0.0 }
 0x2b1   :  { %v791_v13 = vadd.f32 %v790_v10, %v789_v11  ;;  %v784_v15 = vadd.f32 %v783_v12, %v782_v6 }
 0x2b3   :  { %v792_v14 = vrot.slane %v791_v13, 4  ;;  %v785_v18 = vrot.slane %v784_v15, 2 }
 0x2b5   :  { %v793_v16 = vadd.f32 %v792_v14, %v791_v13  ;;  %v786_v20 = vadd.f32 %v785_v18, %v784_v15 }
 0x2b7   :  { %v794_v17 = vrot.slane %v793_v16, 2  ;;  %v787_v22 = vrot.slane %v786_v20, 1 }
 0x2b9   :  { %v795_v19 = vadd.f32 %v794_v17, %v793_v16  ;;  %v788_v25 = vadd.f32 %v787_v22, %v786_v20 }
 0x2bb   :  { %v796_v21 = vrot.slane %v795_v19, 1 }
 0x2bd   :  { %v797_v24 = vadd.f32 %v796_v21, %v795_v19 }
 0x2bf   :  { %v800_v26 = vsel %vm225_vm2, %v797_v24, %v788_v25 }
 0x2c0   :  { %v802_v28 = vadd.f32 %v800_v26, %v759_v27 }
 0x2cb   :  { %v872_v29 = vpop.f32.mrf.mxu0 }
 0x2cc   :  { %v876_v30 = vmul.f32 %v872_v29, %v802_v28 }
 0x2cd   :  { %v1115_v31 = vpop.f32.mrf.mxu0 }
 0x2ce   :  { %v877_v33 = vpack.c.bf16 %v876_v30, %v876_v30 }
 0x2d0   :  { %1125 = vmatmul.mubr.msk.bf16.vlgmr.msra.gmra.mxu1 %vm79_vm0, %v877_v33 }
 0x390   :  { %v962_v35 = vpop.f32.mrf.mxu1 }
 0x391   :  { %v963_v36 = vadd.f32 %v1011_v34, %v962_v35 }
 0x392   :  { %v1126_v37 = vpop.f32.mrf.mxu1 }
 0x393   :  { %969 = vst.msk [vmem:[#allocation2] sm:$0x3] %vm968_vm6, %v963_v36 }
 0x394   :  { %v965_v38 = vpop.f32.mrf.mxu1 }
 0x395   :  { %1174 = shalt.err (!%p1171_p4)
}
 0x396   :  { %979 = dma.vmem_to_hbm [thread:$0]  %s977_s28, 32, %s1441_s10, [#allocation3]   ;;  %v1127_v39 = vpop.f32.mrf.mxu1 }
 0x397   :  { %1183 = dma.done.wait [#allocation3], 32  }
 0x398   :  { %1184 = vsyncadd [#allocation3], 4294967264 }
 0x399   :  { %983 = vsyncpa [#allocation3], 1 }

</bundles_post_ra>
